<compile_context>
chip_gen: v7x
topology: tpu7x:2x2x1
jax: 0.10.0
libtpu: 0.0.40
codegen_flags: <defaults>
</compile_context>

<pallas_src>
import functools

import jax
import jax.numpy as jnp
from jax.experimental import pallas as pl
from jax.experimental.pallas import tpu as pltpu


def _mlp_kernel(depth, chunk, matmul_dtype, act_dtype, final_vpu, *refs):
    """Whole-MLP forward for one tile of batch columns.

    refs = (x_ref, w0, b0, ..., w_{depth-1}, b_{depth-1}, o_ref)
      x_ref : (F_in, tile)   input, batch on lanes
      w_i   : (out_i, in_i)  PyTorch-native Linear weight
               (final layer is passed pre-transposed (in, 1) when final_vpu)
      b_i   : (out_i, 1)     bias (broadcasts over lanes)
      o_ref : (out_dim, tile) lane-dense output slab
    Hidden layers use tanh; the final layer is linear (matches DNN.forward).
    """
    x_ref = refs[0]
    wb = refs[1:1 + 2 * depth]
    o_ref = refs[1 + 2 * depth]

    tile = x_ref.shape[1]
    n_chunks = tile // chunk
    f_in = x_ref.shape[0]

    # ---- hoisted parameter loads / casts (once per grid step, NOT per chunk) ----
    b0 = wb[1][...].astype(jnp.float32)                        # (h0, 1)
    if f_in <= 8:
        w0 = wb[0][...].astype(jnp.float32)                    # (h0, f_in)
        w0_cols = [w0[:, k:k + 1] for k in range(f_in)]        # hoisted lane broadcasts
        w0_mm = None
    else:
        w0_cols = None
        w0_mm = wb[0][...].astype(matmul_dtype)

    hidden_w, hidden_b = [], []
    for i in range(1, depth - 1):
        hidden_w.append(wb[2 * i][...].astype(matmul_dtype))   # MXU operand (bf16)
        hidden_b.append(wb[2 * i + 1][...].astype(act_dtype))  # bias in activation dtype
    if depth >= 2:
        if final_vpu:
            w_last = wb[2 * (depth - 1)][...].astype(jnp.float32)   # (h, 1), pre-transposed
        else:
            w_last = wb[2 * (depth - 1)][...].astype(matmul_dtype)  # (out, h)
        b_last = wb[2 * (depth - 1) + 1][...].astype(jnp.float32)   # (out, 1)

    def body(c, carry):
        start = pl.multiple_of(c * chunk, chunk)
        xc = x_ref[:, pl.ds(start, chunk)].astype(jnp.float32)      # (f_in, chunk)

        # ---- layer 0: tiny contraction dim -> VPU broadcast-FMA, no padded MXU push ----
        if f_in <= 8:
            z = b0
            for k in range(f_in):
                z = z + w0_cols[k] * xc[k:k + 1, :]                 # (h0, chunk)
        else:
            z = jnp.dot(w0_mm, xc.astype(matmul_dtype),
                        preferred_element_type=jnp.float32) + b0
        h = jnp.tanh(z.astype(act_dtype)) if depth > 1 else z

        # ---- hidden layers 1 .. depth-2: bf16 MXU operands, f32 accumulate ----
        for i in range(1, depth - 1):
            z = jnp.dot(hidden_w[i - 1], h.astype(matmul_dtype),
                        preferred_element_type=jnp.float32)
            h = jnp.tanh(z.astype(act_dtype) + hidden_b[i - 1])

        # ---- final linear layer (kept in f32) ----
        if depth >= 2:
            if final_vpu:
                # (h,1) * (h,chunk) -> sublane reduce -> (1,chunk): frees the MXU slot.
                h = jnp.sum(w_last * h.astype(jnp.float32),
                            axis=0, keepdims=True) + b_last
            else:
                h = jnp.dot(w_last, h.astype(matmul_dtype),
                            preferred_element_type=jnp.float32) + b_last

        o_ref[:, pl.ds(start, chunk)] = h.astype(o_ref.dtype)
        return carry

    # fori_loop (not a static Python loop) bounds live vreg ranges across chunks.
    jax.lax.fori_loop(0, n_chunks, body, None, unroll=(n_chunks <= 4))


def _default_act_dtype():
    """bf16 activation path on v6e/v7x (bf16 VPU/EUP); f32 elsewhere (v5e/v4)."""
    try:
        kind = jax.devices()[0].device_kind.lower()
    except Exception:
        return jnp.float32
    if "v6" in kind or "v7" in kind:
        return jnp.bfloat16
    return jnp.float32


def mlp_forward(x, params, *, tile=2048, chunk=256,
                matmul_dtype=jnp.bfloat16, act_dtype=None):
    """Run the DNN forward pass with a Pallas TPU kernel.

    x:      (N, layers[0]) float32.
    params: list of (W, b) with W: (out, in) (PyTorch native), b: (out, 1).
    Returns (N, layers[-1]) float32.
    """
    N, F = x.shape
    depth = len(params)
    out_dim = params[-1][0].shape[0]
    if act_dtype is None:
        act_dtype = _default_act_dtype()

    # Tile/chunk hygiene: lane-multiple chunk, chunk-multiple tile, and cap the
    # tile so the grid keeps >= 2 steps when the batch allows it (v7x: 2 TCs).
    chunk = max(128, (chunk // 128) * 128)
    tile = max(chunk, (tile // chunk) * chunk)
    half = -(-N // 2)                       # ceil(N/2)
    half = -(-half // chunk) * chunk        # round up to a chunk multiple
    tile = min(tile, max(chunk, half))
    assert tile % chunk == 0 and chunk % 128 == 0

    # Pad the batch so the grid covers every row (no silent tail drop).
    n_pad = -(-N // tile) * tile
    x_t = x.T                               # (F, N) — batch on lanes
    if n_pad != N:
        x_t = jnp.pad(x_t, ((0, 0), (0, n_pad - N)))

    final_vpu = (out_dim == 1 and depth >= 2)

    in_specs = [pl.BlockSpec((F, tile), lambda i: (0, i))]
    flat_args = [x_t]
    for li, (w, b) in enumerate(params):
        if final_vpu and li == depth - 1:
            w = w.T                         # (hidden, 1): pre-transposed for the VPU path
        # Weights/biases are tiny: constant index_map keeps them resident.
        in_specs.append(pl.BlockSpec(w.shape, lambda i: (0, 0)))
        in_specs.append(pl.BlockSpec(b.shape, lambda i: (0, 0)))
        flat_args.extend((w, b))
    out_specs = pl.BlockSpec((out_dim, tile), lambda i: (0, i))

    kernel = functools.partial(_mlp_kernel, depth, chunk,
                               matmul_dtype, act_dtype, final_vpu)

    out_t = pl.pallas_call(
        kernel,
        out_shape=jax.ShapeDtypeStruct((out_dim, n_pad), jnp.float32),
        grid=(n_pad // tile,),
        in_specs=in_specs,
        out_specs=out_specs,
        compiler_params=pltpu.CompilerParams(
            dimension_semantics=("parallel",)),
    )(*flat_args)

    return out_t[:, :N].T                   # (N, out_dim)


def init_params(layers, key):
    """Deterministic synthetic parameters in PyTorch-native shapes.

    PyTorch Linear(layers[i], layers[i+1]) has W: (out, in), b: (out,).
    We keep W as (out, in) and store b as (out, 1).
    """
    params = []
    for i in range(len(layers) - 1):
        key, kw, kb = jax.random.split(key, 3)
        bound = 1.0 / (layers[i] ** 0.5)
        w = jax.random.uniform(kw, (layers[i + 1], layers[i]),
                               jnp.float32, -bound, bound)
        b = jax.random.uniform(kb, (layers[i + 1], 1),
                               jnp.float32, -bound, bound)
        params.append((w, b))
    return params


def mlp_reference(x, params):
    """Pure-JAX f32 reference matching DNN.forward (x: (N, F_in))."""
    h = x
    depth = len(params)
    for i, (w, b) in enumerate(params):
        z = h @ w.T + b[:, 0]
        h = jnp.tanh(z) if i < depth - 1 else z
    return h


if __name__ == "__main__":
    # Typical PINN architecture for this module: 2 inputs (x, z), tanh hidden
    # layers, 1 output (wavefield component).
    layers = [2, 32, 32, 32, 1]
    N = 1024          # collocation points; tile auto-caps to 512 -> 2 grid steps

    key = jax.random.PRNGKey(0)
    key, kx = jax.random.split(key)
    x = jax.random.normal(kx, (N, layers[0]), jnp.float32)
    params = init_params(layers, key)
    ref = mlp_reference(x, params)

    # Fast path (default): bf16 MXU operands, activation dtype auto per chip.
    out_fast = jax.block_until_ready(mlp_forward(x, params))
    assert out_fast.shape == (N, layers[-1])
    assert jnp.max(jnp.abs(out_fast - ref)) < 5e-2, "bf16-path mismatch vs reference"

    # Strict f32 path: validates exact forward semantics to tight tolerance.
    out_exact = jax.block_until_ready(
        mlp_forward(x, params, matmul_dtype=jnp.float32, act_dtype=jnp.float32))
    assert jnp.max(jnp.abs(out_exact - ref)) < 1e-4, "f32-path mismatch vs reference"

    print("KERNEL_OK")
</pallas_src>

<mosaic_0001>
module attributes {stable_mosaic.version = 11 : i64} {
  func.func @_mlp_kernel(%arg0: i32, %arg1: memref<2x512xf32, #tpu.memory_space<vmem>>, %arg2: memref<32x2xf32, #tpu.memory_space<vmem>>, %arg3: memref<32x1xf32, #tpu.memory_space<vmem>>, %arg4: memref<32x32xf32, #tpu.memory_space<vmem>>, %arg5: memref<32x1xf32, #tpu.memory_space<vmem>>, %arg6: memref<32x32xf32, #tpu.memory_space<vmem>>, %arg7: memref<32x1xf32, #tpu.memory_space<vmem>>, %arg8: memref<32x1xf32, #tpu.memory_space<vmem>>, %arg9: memref<1x1xf32, #tpu.memory_space<vmem>>, %arg10: memref<1x512xf32, #tpu.memory_space<vmem>>) attributes {dimension_semantics = [#tpu.dimension_semantics<parallel>], iteration_bounds = array<i64: 2>, scalar_prefetch = 0 : i64, scratch_operands = 0 : i64, tpu.core_type = #tpu.core_type<tc>, window_params = [{transform_indices = @transform_0, window_bounds = array<i64: 2, 512>}, {pipeline_mode = #tpu.pipeline_mode<synchronous>, transform_indices = @transform_1, window_bounds = array<i64: 32, 2>}, {pipeline_mode = #tpu.pipeline_mode<synchronous>, transform_indices = @transform_2, window_bounds = array<i64: 32, 1>}, {pipeline_mode = #tpu.pipeline_mode<synchronous>, transform_indices = @transform_3, window_bounds = array<i64: 32, 32>}, {pipeline_mode = #tpu.pipeline_mode<synchronous>, transform_indices = @transform_4, window_bounds = array<i64: 32, 1>}, {pipeline_mode = #tpu.pipeline_mode<synchronous>, transform_indices = @transform_5, window_bounds = array<i64: 32, 32>}, {pipeline_mode = #tpu.pipeline_mode<synchronous>, transform_indices = @transform_6, window_bounds = array<i64: 32, 1>}, {pipeline_mode = #tpu.pipeline_mode<synchronous>, transform_indices = @transform_7, window_bounds = array<i64: 32, 1>}, {pipeline_mode = #tpu.pipeline_mode<synchronous>, transform_indices = @transform_8, window_bounds = array<i64: 1, 1>}, {transform_indices = @transform_9, window_bounds = array<i64: 1, 512>}]} {
    %c0 = arith.constant 0 : index
    %c0_0 = arith.constant 0 : index
    %0 = vector.load %arg3[%c0, %c0_0] : memref<32x1xf32, #tpu.memory_space<vmem>>, vector<32x1xf32>
    %c0_1 = arith.constant 0 : index
    %c0_2 = arith.constant 0 : index
    %1 = vector.load %arg2[%c0_1, %c0_2] : memref<32x2xf32, #tpu.memory_space<vmem>>, vector<32x2xf32>
    %2 = vector.extract_strided_slice %1 {offsets = [0, 0], sizes = [32, 1], strides = [1, 1]} : vector<32x2xf32> to vector<32x1xf32>
    %3 = vector.extract_strided_slice %1 {offsets = [0, 1], sizes = [32, 1], strides = [1, 1]} : vector<32x2xf32> to vector<32x1xf32>
    %c0_3 = arith.constant 0 : index
    %c0_4 = arith.constant 0 : index
    %4 = vector.load %arg4[%c0_3, %c0_4] : memref<32x32xf32, #tpu.memory_space<vmem>>, vector<32x32xf32>
    %5 = arith.truncf %4 : vector<32x32xf32> to vector<32x32xbf16>
    %c0_5 = arith.constant 0 : index
    %c0_6 = arith.constant 0 : index
    %6 = vector.load %arg5[%c0_5, %c0_6] : memref<32x1xf32, #tpu.memory_space<vmem>>, vector<32x1xf32>
    %c0_7 = arith.constant 0 : index
    %c0_8 = arith.constant 0 : index
    %7 = vector.load %arg6[%c0_7, %c0_8] : memref<32x32xf32, #tpu.memory_space<vmem>>, vector<32x32xf32>
    %8 = arith.truncf %7 : vector<32x32xf32> to vector<32x32xbf16>
    %c0_9 = arith.constant 0 : index
    %c0_10 = arith.constant 0 : index
    %9 = vector.load %arg7[%c0_9, %c0_10] : memref<32x1xf32, #tpu.memory_space<vmem>>, vector<32x1xf32>
    %c0_11 = arith.constant 0 : index
    %c0_12 = arith.constant 0 : index
    %10 = vector.load %arg8[%c0_11, %c0_12] : memref<32x1xf32, #tpu.memory_space<vmem>>, vector<32x1xf32>
    %c0_13 = arith.constant 0 : index
    %c0_14 = arith.constant 0 : index
    %11 = vector.load %arg9[%c0_13, %c0_14] : memref<1x1xf32, #tpu.memory_space<vmem>>, vector<1x1xf32>
    %c0_i32 = arith.constant 0 : i32
    %c256_i32 = arith.constant 256 : i32
    %12 = arith.muli %c0_i32, %c256_i32 : i32
    %13 = tpu.assume_multiple %12, 256 : i32
    %c0_15 = arith.constant 0 : index
    %14 = arith.index_cast %13 : i32 to index
    %15 = vector.load %arg1[%c0_15, %14] : memref<2x512xf32, #tpu.memory_space<vmem>>, vector<2x256xf32>
    %16 = vector.extract_strided_slice %15 {offsets = [0, 0], sizes = [1, 256], strides = [1, 1]} : vector<2x256xf32> to vector<1x256xf32>
    %17 = vector.broadcast %2 : vector<32x1xf32> to vector<32x256xf32>
    %18 = vector.broadcast %16 : vector<1x256xf32> to vector<32x256xf32>
    %19 = arith.mulf %17, %18 : vector<32x256xf32>
    %20 = vector.broadcast %0 : vector<32x1xf32> to vector<32x256xf32>
    %21 = arith.addf %20, %19 : vector<32x256xf32>
    %22 = vector.extract_strided_slice %15 {offsets = [1, 0], sizes = [1, 256], strides = [1, 1]} : vector<2x256xf32> to vector<1x256xf32>
    %23 = vector.broadcast %3 : vector<32x1xf32> to vector<32x256xf32>
    %24 = vector.broadcast %22 : vector<1x256xf32> to vector<32x256xf32>
    %25 = arith.mulf %23, %24 : vector<32x256xf32>
    %26 = arith.addf %21, %25 : vector<32x256xf32>
    %27 = math.tanh %26 : vector<32x256xf32>
    %28 = arith.truncf %27 : vector<32x256xf32> to vector<32x256xbf16>
    %cst = arith.constant dense<0.000000e+00> : vector<32x256xf32>
    %29 = tpu.matmul %5, %28, %cst {dimension_numbers = #tpu.dot_dimension_numbers<[1], [0], [0], [1], [0, 0, 1, 1], [], []>} : vector<32x32xbf16>, vector<32x256xbf16>, vector<32x256xf32> -> vector<32x256xf32>
    %30 = vector.broadcast %6 : vector<32x1xf32> to vector<32x256xf32>
    %31 = arith.addf %29, %30 : vector<32x256xf32>
    %32 = math.tanh %31 : vector<32x256xf32>
    %33 = arith.truncf %32 : vector<32x256xf32> to vector<32x256xbf16>
    %cst_16 = arith.constant dense<0.000000e+00> : vector<32x256xf32>
    %34 = tpu.matmul %8, %33, %cst_16 {dimension_numbers = #tpu.dot_dimension_numbers<[1], [0], [0], [1], [0, 0, 1, 1], [], []>} : vector<32x32xbf16>, vector<32x256xbf16>, vector<32x256xf32> -> vector<32x256xf32>
    %35 = vector.broadcast %9 : vector<32x1xf32> to vector<32x256xf32>
    %36 = arith.addf %34, %35 : vector<32x256xf32>
    %37 = math.tanh %36 : vector<32x256xf32>
    %38 = vector.broadcast %10 : vector<32x1xf32> to vector<32x256xf32>
    %39 = arith.mulf %38, %37 : vector<32x256xf32>
    %cst_17 = arith.constant dense<0.000000e+00> : vector<256xf32>
    %40 = vector.multi_reduction <add>, %39, %cst_17 [0] : vector<32x256xf32> to vector<256xf32>
    %41 = vector.shape_cast %40 : vector<256xf32> to vector<1x256xf32>
    %42 = vector.broadcast %11 : vector<1x1xf32> to vector<1x256xf32>
    %43 = arith.addf %41, %42 : vector<1x256xf32>
    %c0_18 = arith.constant 0 : index
    %44 = arith.index_cast %13 : i32 to index
    %45 = vector.load %arg10[%c0_18, %44] : memref<1x512xf32, #tpu.memory_space<vmem>>, vector<1x256xf32>
    tpu.vector_store %arg10[%c0_18, %44], %43 {strides = array<i32>} : memref<1x512xf32, #tpu.memory_space<vmem>>, vector<1x256xf32>,
    %c1_i32 = arith.constant 1 : i32
    %c256_i32_19 = arith.constant 256 : i32
    %46 = arith.muli %c1_i32, %c256_i32_19 : i32
    %47 = tpu.assume_multiple %46, 256 : i32
    %c0_20 = arith.constant 0 : index
    %48 = arith.index_cast %47 : i32 to index
    %49 = vector.load %arg1[%c0_20, %48] : memref<2x512xf32, #tpu.memory_space<vmem>>, vector<2x256xf32>
    %50 = vector.extract_strided_slice %49 {offsets = [0, 0], sizes = [1, 256], strides = [1, 1]} : vector<2x256xf32> to vector<1x256xf32>
    %51 = vector.broadcast %2 : vector<32x1xf32> to vector<32x256xf32>
    %52 = vector.broadcast %50 : vector<1x256xf32> to vector<32x256xf32>
    %53 = arith.mulf %51, %52 : vector<32x256xf32>
    %54 = vector.broadcast %0 : vector<32x1xf32> to vector<32x256xf32>
    %55 = arith.addf %54, %53 : vector<32x256xf32>
    %56 = vector.extract_strided_slice %49 {offsets = [1, 0], sizes = [1, 256], strides = [1, 1]} : vector<2x256xf32> to vector<1x256xf32>
    %57 = vector.broadcast %3 : vector<32x1xf32> to vector<32x256xf32>
    %58 = vector.broadcast %56 : vector<1x256xf32> to vector<32x256xf32>
    %59 = arith.mulf %57, %58 : vector<32x256xf32>
    %60 = arith.addf %55, %59 : vector<32x256xf32>
    %61 = math.tanh %60 : vector<32x256xf32>
    %62 = arith.truncf %61 : vector<32x256xf32> to vector<32x256xbf16>
    %cst_21 = arith.constant dense<0.000000e+00> : vector<32x256xf32>
    %63 = tpu.matmul %5, %62, %cst_21 {dimension_numbers = #tpu.dot_dimension_numbers<[1], [0], [0], [1], [0, 0, 1, 1], [], []>} : vector<32x32xbf16>, vector<32x256xbf16>, vector<32x256xf32> -> vector<32x256xf32>
    %64 = vector.broadcast %6 : vector<32x1xf32> to vector<32x256xf32>
    %65 = arith.addf %63, %64 : vector<32x256xf32>
    %66 = math.tanh %65 : vector<32x256xf32>
    %67 = arith.truncf %66 : vector<32x256xf32> to vector<32x256xbf16>
    %cst_22 = arith.constant dense<0.000000e+00> : vector<32x256xf32>
    %68 = tpu.matmul %8, %67, %cst_22 {dimension_numbers = #tpu.dot_dimension_numbers<[1], [0], [0], [1], [0, 0, 1, 1], [], []>} : vector<32x32xbf16>, vector<32x256xbf16>, vector<32x256xf32> -> vector<32x256xf32>
    %69 = vector.broadcast %9 : vector<32x1xf32> to vector<32x256xf32>
    %70 = arith.addf %68, %69 : vector<32x256xf32>
    %71 = math.tanh %70 : vector<32x256xf32>
    %72 = vector.broadcast %10 : vector<32x1xf32> to vector<32x256xf32>
    %73 = arith.mulf %72, %71 : vector<32x256xf32>
    %cst_23 = arith.constant dense<0.000000e+00> : vector<256xf32>
    %74 = vector.multi_reduction <add>, %73, %cst_23 [0] : vector<32x256xf32> to vector<256xf32>
    %75 = vector.shape_cast %74 : vector<256xf32> to vector<1x256xf32>
    %76 = vector.broadcast %11 : vector<1x1xf32> to vector<1x256xf32>
    %77 = arith.addf %75, %76 : vector<1x256xf32>
    %c0_24 = arith.constant 0 : index
    %78 = arith.index_cast %47 : i32 to index
    %79 = vector.load %arg10[%c0_24, %78] : memref<1x512xf32, #tpu.memory_space<vmem>>, vector<1x256xf32>
    tpu.vector_store %arg10[%c0_24, %78], %77 {strides = array<i32>} : memref<1x512xf32, #tpu.memory_space<vmem>>, vector<1x256xf32>,
    %c2_i32 = arith.constant 2 : i32
    return
  }
  func.func @transform_0(%arg0: i32) -> (i32, i32) {
    %c0_i32 = arith.constant 0 : i32
    %c0_i32_0 = arith.constant 0 : i32
    return %c0_i32, %arg0 : i32, i32
  }
  func.func @transform_1(%arg0: i32) -> (i32, i32) {
    %c0_i32 = arith.constant 0 : i32
    %c0_i32_0 = arith.constant 0 : i32
    %c0_i32_1 = arith.constant 0 : i32
    return %c0_i32, %c0_i32_0 : i32, i32
  }
  func.func @transform_2(%arg0: i32) -> (i32, i32) {
    %c0_i32 = arith.constant 0 : i32
    %c0_i32_0 = arith.constant 0 : i32
    %c0_i32_1 = arith.constant 0 : i32
    return %c0_i32, %c0_i32_0 : i32, i32
  }
  func.func @transform_3(%arg0: i32) -> (i32, i32) {
    %c0_i32 = arith.constant 0 : i32
    %c0_i32_0 = arith.constant 0 : i32
    %c0_i32_1 = arith.constant 0 : i32
    return %c0_i32, %c0_i32_0 : i32, i32
  }
  func.func @transform_4(%arg0: i32) -> (i32, i32) {
    %c0_i32 = arith.constant 0 : i32
    %c0_i32_0 = arith.constant 0 : i32
    %c0_i32_1 = arith.constant 0 : i32
    return %c0_i32, %c0_i32_0 : i32, i32
  }
  func.func @transform_5(%arg0: i32) -> (i32, i32) {
    %c0_i32 = arith.constant 0 : i32
    %c0_i32_0 = arith.constant 0 : i32
    %c0_i32_1 = arith.constant 0 : i32
    return %c0_i32, %c0_i32_0 : i32, i32
  }
  func.func @transform_6(%arg0: i32) -> (i32, i32) {
    %c0_i32 = arith.constant 0 : i32
    %c0_i32_0 = arith.constant 0 : i32
    %c0_i32_1 = arith.constant 0 : i32
    return %c0_i32, %c0_i32_0 : i32, i32
  }
  func.func @transform_7(%arg0: i32) -> (i32, i32) {
    %c0_i32 = arith.constant 0 : i32
    %c0_i32_0 = arith.constant 0 : i32
    %c0_i32_1 = arith.constant 0 : i32
    return %c0_i32, %c0_i32_0 : i32, i32
  }
  func.func @transform_8(%arg0: i32) -> (i32, i32) {
    %c0_i32 = arith.constant 0 : i32
    %c0_i32_0 = arith.constant 0 : i32
    %c0_i32_1 = arith.constant 0 : i32
    return %c0_i32, %c0_i32_0 : i32, i32
  }
  func.func @transform_9(%arg0: i32) -> (i32, i32) {
    %c0_i32 = arith.constant 0 : i32
    %c0_i32_0 = arith.constant 0 : i32
    return %c0_i32, %arg0 : i32, i32
  }
}

</mosaic_0001>

<bundles_post_ra>
// kernel: tpu_custom_call.1
= control target key start
LH: loop header
LB: loop body
LE: loop exit
PB: predicated region body
PF: predicated region fallthrough
CT: control target
= control target key end

     0   :  { %s1646_s0 = inlined_call_operand.vmem [shape: f32[2,1024], index: 0, kind: input, shape index: {}]   ;;  %s1647_s1 = inlined_call_operand.vmem [shape: f32[32,2], index: 1, kind: input, shape index: {}]   ;;  %s1648_s2 = inlined_call_operand.vmem [shape: f32[32,1], index: 2, kind: input, shape index: {}]   ;;  %s1649_s3 = inlined_call_operand.vmem [shape: f32[32,32], index: 3, kind: input, shape index: {}]   ;;  %s1650_s4 = inlined_call_operand.vmem [shape: f32[32,1], index: 4, kind: input, shape index: {}]   ;;  %s1651_s5 = inlined_call_operand.vmem [shape: f32[32,32], index: 5, kind: input, shape index: {}]   ;;  %s1652_s6 = inlined_call_operand.vmem [shape: f32[32,1], index: 6, kind: input, shape index: {}]   ;;  %s1653_s7 = inlined_call_operand.vmem [shape: f32[32,1], index: 7, kind: input, shape index: {}]   ;;  %s1654_s8 = inlined_call_operand.<no memory space> [shape: f32[1,1], index: 8, kind: input, shape index: {}]   ;;  %s1655_s9 = inlined_call_operand.hbm [shape: f32[1,1024], index: 9, kind: output, shape index: {}]  }
   0x1   :  { %v14_v0 = vstv %s1654_s8 }
   0x2   :  { %15 = vst [vmem:[#allocation2] sm:$0x1] %v14_v0 }
   0x3   :  { %16 = vsyncpa [#allocation4], 0 }
   0x4   :  { %18 = vsyncpa [#allocation4 + $0x1], 0  ;;  %s1388_s11 = smov 0   ;;  %s1390_s12 = smov 0  }
   0x5   :  { %s1392_s13 = smov 0   ;;  %s1394_s14 = smov 0  }
   0x6 LB: > { %s1409_s8 = sadd.s32 4294967295, %s1329_s14   ;;  %s1098_s15 = sadd.s32 4294967294, %s1329_s14   ;;  %s1329_s14 = sphi %s1394_s14, %s1663_s14   ;;  %s1325_s13 = sphi %s1392_s13, %s1662_s13   ;;  %s1321_s12 = sphi %s1390_s12, %s1661_s12   ;;  %s1317_s11 = sphi %s1388_s11, %s1660_s11  }
   0x7   : > { %s1413_s16 = sadd.s32 1, %s1329_s14   ;;  %s225_s17 = sadd.s32 1, %s1325_s13 }
   0x8   : > { %s222_s18 = ssub.s32 %s1329_s14, %s1413_s16  ;;  %p235_p0 = scmp.ne.s32.totalorder %s1325_s13, %s1321_s12 }
   0x9   : > { %p223_p1 = scmp.eq.s32.totalorder %s222_s18, 0  ;;  %p236_p2 = scmp.eq.s32.totalorder %s1409_s8, 1 }
   0xa   : > { %p241_p3 = scmp.ne.s32.totalorder %s1321_s12, %s1317_s11  ;;  %p242_p4 = scmp.eq.s32.totalorder %s1098_s15, 1 }
   0xb   : > { %s1424_s19 = scalar_select %p223_p1, %s1325_s13, %s225_s17  }
   0xc   : > { %p1426_p5 = por %p236_p2, %p235_p0  ;;  %p1430_p6 = por %p242_p4, %p241_p3 }
   0xd   : > { %p1101_p7 = scmp.ge.s32.totalorder %s1329_s14, 1  ;;  %p293_p8 = scmp.lt.s32.totalorder %s1329_s14, 3 }
   0xf   : > { %p294_p9 = pnand %p1101_p7, %p293_p8 }
  0x10   : > { %v341_v1 = vld [vmem:[%s1647_s1] sm:$0xff] (!%p294_p9)  ;;  %v1331_v3 = vmov (!%p294_p9), 0   ;;  %v342_v4 = vld [vmem:[%s1647_s1 + $0x8] sm:$0xff] (!%p294_p9)  ;;  %v344_v6 = vld [vmem:[%s1647_s1 + $0x18] sm:$0xff] (!%p294_p9)  ;;  %v1332_v7 = vmov (!%p294_p9), 1   ;;  %s1103_s23 = sshll.u32 (!%p294_p9), %s1409_s8, 2  ;;  %v392_v24 = vlaneseq (!%p294_p9) }
  0x11   : > { %297 = sbr.rel (%p294_p9) target bundleno = 727 (0x2d7), region = 56  ;;  %v337_v2 = vld [vmem:[%s1648_s2] sm:$0xff] (!%p294_p9)  ;;  %1164 = vset.pattern.permute.xlu1 (!%p294_p9), %v1331_v3  ;;  %1163 = vset.pattern.permute.xlu0 (!%p294_p9), %v1331_v3  ;;  %v338_v5 = vld [vmem:[%s1648_s2 + $0x8] sm:$0xff] (!%p294_p9)  ;;  %v343_v8 = vld [vmem:[%s1647_s1 + $0x10] sm:$0xff] (!%p294_p9)  ;;  %p330_p10 = scmp.lt.s32.totalorder (!%p294_p9), %s1103_s23, 7  ;;  %vm528_vm0 = vcmask (!%p294_p9), 261120  }
  0x12   : > { %373 = vperm.xlu0 (!%p294_p9), %1163, %v341_v1   ;;  %420 = vperm.xlu1 (!%p294_p9), %1164, %v337_v2   ;;  %v339_v9 = vld [vmem:[%s1648_s2 + $0x10] sm:$0xff] (!%p294_p9)  ;;  %v340_v10 = vld [vmem:[%s1648_s2 + $0x18] sm:$0xff] (!%p294_p9)  ;;  %v351_v11 = vld [vmem:[%s1650_s4] sm:$0xff] (!%p294_p9)  ;;  %v1505_v25 = vshrl.u32 (!%p294_p9), %v392_v24, 7  ;;  %s326_s10 = sand.u32 (!%p294_p9), 1, %s1321_s12   ;;  %vm1590_vm1 = vcmp.lt.s32.totalorder (!%p294_p9), %v392_v24, 256 }
  0x13   : > { %567 = vmatprep.mubr.bf16.mxu0 (!%p294_p9), %v1331_v3  ;;  %658 = vmatprep.mubr.bf16.mxu1 (!%p294_p9), %v1331_v3  ;;  %v352_v12 = vld [vmem:[%s1650_s4 + $0x8] sm:$0xff] (!%p294_p9)  ;;  %v353_v13 = vld [vmem:[%s1650_s4 + $0x10] sm:$0xff] (!%p294_p9)  ;;  %v361_v14 = vld [vmem:[%s1652_s6] sm:$0xff] (!%p294_p9)  ;;  %s1102_s15 = sshll.u32 (!%p294_p9), %s326_s10, 2  ;;  %s1120_s18 = sshll.u32 (!%p294_p9), %s1409_s8, 6 }
  0x14   : > { %v354_v15 = vld [vmem:[%s1650_s4 + $0x18] sm:$0xff] (!%p294_p9)  ;;  %v363_v16 = vld [vmem:[%s1652_s6 + $0x10] sm:$0xff] (!%p294_p9)  ;;  %v362_v17 = vld [vmem:[%s1652_s6 + $0x8] sm:$0xff] (!%p294_p9)  ;;  %v1511_v26 = vsub.s32 (!%p294_p9), 0, %v1505_v25  ;;  %v398_v27 = vsub.s32 (!%p294_p9), 2, %v1505_v25  ;;  %v464_v29 = vsub.s32 (!%p294_p9), 1, %v1505_v25  ;;  %s1600_s25 = scalar_lea.hbm (!%p294_p9), %s1655_s9, %s1120_s18 }
  0x15   : > { %v365_v18 = vld [vmem:[%s1653_s7] sm:$0xff] (!%p294_p9)  ;;  %v364_v19 = vld [vmem:[%s1652_s6 + $0x18] sm:$0xff] (!%p294_p9)  ;;  %v367_v20 = vld [vmem:[%s1653_s7 + $0x10] sm:$0xff] (!%p294_p9)  ;;  %v468_v32 = vsub.s32 (!%p294_p9), 3, %v1505_v25  ;;  %s328_s17 = scalar_lea.vmem (!%p294_p9), [#allocation3], %s1102_s15  ;;  %s1025_s26 = scalar_lea.sflag (!%p294_p9), [#allocation4], %s326_s10 }
  0x16   : > { %378 = vperm.xlu0 (!%p294_p9), %1163, %v342_v4   ;;  %425 = vperm.xlu1 (!%p294_p9), %1164, %v338_v5   ;;  %v366_v21 = vld [vmem:[%s1653_s7 + $0x8] sm:$0xff] (!%p294_p9)  ;;  %v369_v22 = vld [vmem:[#allocation2] sm:$0x1] (!%p294_p9)  ;;  %v368_v23 = vld [vmem:[%s1653_s7 + $0x18] sm:$0xff] (!%p294_p9)  ;;  %s1039_s22 = sshll.u32 (!%p294_p9), %s328_s17, 4  ;;  %s1334_s8 = smov (!%p294_p9), [#allocation3]   ;;  %s1602_s22 = int_to_ptr.vmem [resolvable:$true] %s1039_s22 }
  0x17   : > { %s1271_s28 = sshll.u32 (!%p294_p9), %s1334_s8, 4  ;;  %s1272_s28 = int_to_ptr.vmem [resolvable:$false] %s1271_s28 }
  0x18   : > { %s1665_s23 = smov (!%p330_p10, %s1103_s23), 7  ;;  %s1273_s29 = scalar_lea.vmem %s1272_s28, 128 }
  0x19   : > { %s1104_s24 = sshll.u32 %s1665_s23, 1  ;;  %p1274_p0 = scmp.lt.s32.totalorder %s1602_s22, %s1272_s28 }
  0x1a   : > { %388 = vperm.xlu0 %1163, %v344_v6   ;;  %1165 = vset.pattern.permute.xlu1 %v1332_v7  ;;  %s333_s27 = scalar_lea.vmem %s1646_s0, %s1104_s24 }
  0x1b   : > { %451 = vperm.xlu1 %1165, %v342_v4   ;;  %v370_v28 = vld [vmem:[%s333_s27] sm:$0xf]  ;;  %v1109_v43 = vld [vmem:[%s333_s27 + $0x4] sm:$0xf]  ;;  %s1267_s27 = scalar_lea.vmem %s1602_s22, 64 }
  0x1c   : > { %v395_v33 = vrot.slane %v370_v28, %v1511_v26  ;;  %v399_v34 = vrot.slane %v370_v28, %v398_v27  ;;  %v465_v35 = vrot.slane %v370_v28, %v464_v29  ;;  %v469_v38 = vrot.slane %v370_v28, %v468_v32  ;;  %p1268_p11 = scmp.ne.s32.totalorder %s1602_s22, %s1267_s27  ;;  %p1275_p1 = scmp.lt.s32.totalorder %s1273_s29, %s1267_s27 }
  0x1d   : > { %v777_v51 = vrot.slane %v1109_v43, %v398_v27  ;;  %v773_v53 = vrot.slane %v1109_v43, %v1511_v26  ;;  %v811_v0 = vrot.slane %v1109_v43, %v468_v32 }
  0x1e   : > { %1167 = vset.pattern.permute.xlu0 %v1332_v7  ;;  %v405_v39 = vrot.slane %v395_v33, %v1511_v26  ;;  %v409_v40 = vrot.slane %v399_v34, %v1511_v26  ;;  %v1519_v41 = vrot.slane %v465_v35, %v464_v29  ;;  %v1521_v45 = vrot.slane %v469_v38, %v464_v29  ;;  %p1269_p12 = pnand %p1268_p11, %p1426_p5  ;;  %p1276_p2 = por %p1275_p1, %p1274_p0 }
  0x1f   : > { %447 = vperm.xlu0 %1167, %v341_v1   ;;  %1166 = vset.pattern.permute.xlu1 %v1331_v3  ;;  %v787_v63 = vrot.slane %v777_v51, %v1511_v26  ;;  %v783_v1 = vrot.slane %v773_v53, %v1511_v26 }
  0x20   : > { %383 = vperm.xlu1 %1166, %v343_v8   ;;  %p1270_p13 = pneg %p1269_p12 }
  0x22   : > { %p1277_p3 = pnand %p1276_p2, %p1270_p13 }
  0x23   : > { %455 = vperm.xlu0 %1167, %v343_v8  }
  0x24   : > { %430 = vperm.xlu1 %1166, %v339_v9   ;;  %v821_v9 = vrot.slane %v811_v0, %v464_v29 }
  0x27   : > { %1170 = vset.pattern.permute.xlu0 %v1331_v3 }
  0x28   : > { %435 = vperm.xlu1 %1166, %v340_v10   ;;  %515 = vperm.xlu0 %1170, %v352_v12  }
  0x2c   : > { %1168 = vset.pattern.permute.xlu1 %v1332_v7  ;;  %602 = vperm.xlu0 %1170, %v361_v14  }
  0x2d   : > { %459 = vperm.xlu1 %1168, %v344_v6   ;;  %v807_v6 = vrot.slane %v1109_v43, %v464_v29 }
  0x30   : > { %612 = vperm.xlu0 %1170, %v363_v16  }
  0x31   : > { %1169 = vset.pattern.permute.xlu1 %v1331_v3 }
  0x32   : > { %510 = vperm.xlu1 %1169, %v351_v11  }
  0x34   : > { %689 = vperm.xlu0 %1170, %v365_v18  }
  0x36   : > { %520 = vperm.xlu1 %1169, %v353_v13  }
  0x38   : > { %699 = vperm.xlu0 %1170, %v367_v20  }
  0x3a   : > { %525 = vperm.xlu1 %1169, %v354_v15  }
  0x3c   : > { %735 = vperm.xlu0 %1170, %v369_v22  }
  0x3e   : > { %607 = vperm.xlu1 %1169, %v362_v17   ;;  %v817_v17 = vrot.slane %v807_v6, %v464_v29 }
  0x42   : > { %617 = vperm.xlu1 %1169, %v364_v19  }
  0x46   : > { %694 = vperm.xlu1 %1169, %v366_v21  }
  0x4a   : > { %704 = vperm.xlu1 %1169, %v368_v23  }
  0x91   : > { %v374_v30 = vpop.permute.xlu0 %373  ;;  %v421_v31 = vpop.permute.xlu1 %420 }
  0x92   : > { %v410_v46 = vmul.f32 %v405_v39, %v374_v30  ;;  %v411_v48 = vmul.f32 %v409_v40, %v374_v30  ;;  %v789_v8 = vmul.f32 %v787_v63, %v374_v30  ;;  %v788_v11 = vmul.f32 %v783_v1, %v374_v30 }
  0x94   : > { %v438_v55 = vadd.f32 %v421_v31, %v410_v46  ;;  %v439_v58 = vadd.f32 %v421_v31, %v411_v48  ;;  %v797_v21 = vadd.f32 %v789_v8, %v421_v31  ;;  %v796_v28 = vadd.f32 %v788_v11, %v421_v31 }
  0x95   : > { %v379_v36 = vpop.permute.xlu0 %378  ;;  %v426_v37 = vpop.permute.xlu1 %425 }
  0x96   : > { %v412_v42 = vmul.f32 %v405_v39, %v379_v36  ;;  %v413_v49 = vmul.f32 %v409_v40, %v379_v36  ;;  %v790_v13 = vmul.f32 %v783_v1, %v379_v36  ;;  %v791_v14 = vmul.f32 %v787_v63, %v379_v36 }
  0x98   : > { %v440_v52 = vadd.f32 %v426_v37, %v412_v42  ;;  %v441_v59 = vadd.f32 %v426_v37, %v413_v49  ;;  %v798_v30 = vadd.f32 %v790_v13, %v426_v37  ;;  %v799_v32 = vadd.f32 %v791_v14, %v426_v37  ;;  %v346_v14 = vld [vmem:[%s1649_s3 + $0x8] sm:$0xff] }
  0x99   : > { %v389_v44 = vpop.permute.xlu0 %388 }
  0x9a   : > { %v452_v47 = vpop.permute.xlu1 %451  ;;  %v416_v33 = vmul.f32 %v405_v39, %v389_v44  ;;  %v417_v35 = vmul.f32 %v409_v40, %v389_v44  ;;  %v794_v36 = vmul.f32 %v783_v1, %v389_v44  ;;  %v795_v38 = vmul.f32 %v787_v63, %v389_v44 }
  0x9b   : > { %v482_v50 = vmul.f32 %v1519_v41, %v452_v47  ;;  %v483_v54 = vmul.f32 %v1521_v45, %v452_v47  ;;  %v825_v22 = vmul.f32 %v821_v9, %v452_v47  ;;  %v824_v43 = vmul.f32 %v817_v17, %v452_v47 }
  0x9d   : > { %v490_v56 = vadd.f32 %v482_v50, %v440_v52  ;;  %v491_v2 = vadd.f32 %v483_v54, %v441_v59  ;;  %v833_v46 = vadd.f32 %v825_v22, %v799_v32  ;;  %v348_v32 = vld [vmem:[%s1649_s3 + $0x18] sm:$0xff] }
  0x9e   : > { %v448_v57 = vpop.permute.xlu0 %447 }
  0x9f   : > { %v480_v60 = vmul.f32 %v1519_v41, %v448_v57  ;;  %v481_v61 = vmul.f32 %v1521_v45, %v448_v57  ;;  %v1528_v62 = vpop.permute.xlu1 %383  ;;  %1171 = vtanh.f32 %v490_v56  ;;  %v823_v15 = vmul.f32 %v821_v9, %v448_v57 }
  0xa0   : > { %v414_v12 = vmul.f32 %v405_v39, %v1528_v62  ;;  %v415_v16 = vmul.f32 %v409_v40, %v1528_v62  ;;  %v822_v48 = vmul.f32 %v817_v17, %v448_v57  ;;  %v793_v39 = vmul.f32 %v787_v63, %v1528_v62 }
  0xa1   : > { %v488_v4 = vadd.f32 %v480_v60, %v438_v55  ;;  %v489_v5 = vadd.f32 %v481_v61, %v439_v58  ;;  %v831_v34 = vadd.f32 %v823_v15, %v797_v21  ;;  %v832_v63 = vadd.f32 %v824_v43, %v798_v30  ;;  %v347_v30 = vld [vmem:[%s1649_s3 + $0x10] sm:$0xff] }
  0xa2   : > { %v456_v10 = vpop.permute.xlu0 %455  ;;  %v830_v61 = vadd.f32 %v822_v48, %v796_v28 }
  0xa3   : > { %1173 = vtanh.f32 %v488_v4  ;;  %v1532_v7 = vpop.permute.xlu1 %430  ;;  %v484_v18 = vmul.f32 %v1519_v41, %v456_v10  ;;  %v485_v23 = vmul.f32 %v1521_v45, %v456_v10  ;;  %v827_v40 = vmul.f32 %v821_v9, %v456_v10 }
  0xa4   : > { %1175 = vtanh.f32 %v489_v5  ;;  %v442_v19 = vadd.f32 %v1532_v7, %v414_v12  ;;  %v443_v27 = vadd.f32 %v1532_v7, %v415_v16  ;;  %v801_v58 = vadd.f32 %v793_v39, %v1532_v7 }
  0xa5   : > { %1177 = vtanh.f32 %v491_v2  ;;  %v826_v2 = vmul.f32 %v817_v17, %v456_v10 }
  0xa6   : > { %v492_v29 = vadd.f32 %v484_v18, %v442_v19  ;;  %v493_v49 = vadd.f32 %v485_v23, %v443_v27  ;;  %1179 = vtanh.f32 %v831_v34  ;;  %v835_v6 = vadd.f32 %v827_v40, %v801_v58 }
  0xa7   : > { %v436_v20 = vpop.permute.xlu1 %435  ;;  %v516_v43 = vpop.permute.xlu0 %515 }
  0xa8   : > { %v444_v52 = vadd.f32 %v436_v20, %v416_v33  ;;  %v445_v53 = vadd.f32 %v436_v20, %v417_v35  ;;  %1181 = vtanh.f32 %v492_v29  ;;  %v803_v59 = vadd.f32 %v795_v38, %v436_v20 }
  0xa9   : > { %v1172_v42 = vpop.eup %1171  ;;  %1183 = vtanh.f32 %v493_v49  ;;  %v802_v5 = vadd.f32 %v794_v36, %v436_v20  ;;  %v350_v35 = vpack.c.bf16 %v348_v32, %v347_v30  ;;  %v357_v32 = vld [vmem:[%s1651_s5 + $0x10] sm:$0xff] }
  0xac   : > { %v460_v50 = vpop.permute.xlu1 %459 }
  0xad   : > { %v1174_v51 = vpop.eup %1173  ;;  %v486_v54 = vmul.f32 %v1519_v41, %v460_v50  ;;  %v487_v31 = vmul.f32 %v1521_v45, %v460_v50  ;;  %v829_v44 = vmul.f32 %v821_v9, %v460_v50  ;;  %v792_v41 = vmul.f32 %v783_v1, %v1528_v62 }
  0xae   : > { %v1176_v37 = vpop.eup %1175  ;;  %v504_v57 = vpack.c.bf16 %v1172_v42, %v1174_v51  ;;  %v828_v45 = vmul.f32 %v817_v17, %v460_v50 }
  0xaf   : > { %v1178_v55 = vpop.eup %1177  ;;  %v494_v47 = vadd.f32 %v486_v54, %v444_v52  ;;  %v495_v56 = vadd.f32 %v487_v31, %v445_v53  ;;  %v837_v0 = vadd.f32 %v829_v44, %v803_v59  ;;  %v800_v4 = vadd.f32 %v792_v41, %v1532_v7  ;;  %v345_v7 = vld [vmem:[%s1649_s3] sm:$0xff] }
  0xb0   : > { %v505_v60 = vpack.c.bf16 %v1178_v55, %v1176_v37  ;;  %v836_v8 = vadd.f32 %v828_v45, %v802_v5  ;;  %v1180_v11 = vpop.eup %1179  ;;  %v349_v19 = vpack.c.bf16 %v346_v14, %v345_v7 }
  0xb1   : > { %1185 = vtanh.f32 %v494_v47  ;;  %v834_v9 = vadd.f32 %v826_v2, %v800_v4  ;;  %v511_v36 = vpop.permute.xlu1 %510 }
  0xb2   : > { %1187 = vtanh.f32 %v495_v56  ;;  %535 = vmatprep.subr.bf16.mxu0 %v505_v60  ;;  %v1182_v62 = vpop.eup %1181 }
  0xb3   : > { %536 = vmatpush1.bf16.msra.mxu0 %v504_v57  ;;  %1189 = vtanh.f32 %v833_v46  ;;  %v1184_v1 = vpop.eup %1183 }
  0xb4   : > { %1191 = vtanh.f32 %v830_v61 }
  0xb5   : > { %1193 = vtanh.f32 %v837_v0  ;;  %v521_v51 = vpop.permute.xlu1 %520 }
  0xb6   : > { %1195 = vtanh.f32 %v832_v63 }
  0xb7   : > { %1197 = vtanh.f32 %v835_v6 }
  0xb8   : > { %1199 = vtanh.f32 %v836_v8 }
  0xb9   : > { %1201 = vtanh.f32 %v834_v9  ;;  %v526_v37 = vpop.permute.xlu1 %525 }
  0xbb   : > { %v1186_v12 = vpop.eup %1185 }
  0xbc   : > { %v1188_v13 = vpop.eup %1187  ;;  %v506_v10 = vpack.c.bf16 %v1186_v12, %v1182_v62 }
  0xbd   : > { %v507_v15 = vpack.c.bf16 %v1188_v13, %v1184_v1  ;;  %v1190_v16 = vpop.eup %1189  ;;  %v355_v13 = vld [vmem:[%s1651_s5] sm:$0xff] }
  0xbe   : > { %v1192_v17 = vpop.eup %1191  ;;  %v847_v18 = vpack.c.bf16 %v1190_v16, %v1180_v11 }
  0xbf   : > { %537 = vmatprep.subr.bf16.mxu0 %v507_v15  ;;  %v1194_v20 = vpop.eup %1193 }
  0xc0   : > { %538 = vmatpush1.bf16.msra.mxu0 %v506_v10  ;;  %v1196_v21 = vpop.eup %1195  ;;  %v356_v10 = vld [vmem:[%s1651_s5 + $0x8] sm:$0xff] }
  0xc1   : > { %850 = vmatprep.subr.bf16.mxu0 %v847_v18  ;;  %v1198_v22 = vpop.eup %1197  ;;  %v846_v23 = vpack.c.bf16 %v1196_v21, %v1192_v17 }
  0xc2   : > { %v1200_v27 = vpop.eup %1199  ;;  %v849_v28 = vpack.c.bf16 %v1194_v20, %v1198_v22  ;;  %v359_v20 = vpack.c.bf16 %v356_v10, %v355_v13 }
  0xc3   : > { %1105 = vmatmul.mubr.msk.bf16.vlgmr.msra.gmra.mrb[0].mxu0 %vm528_vm0, %v349_v19  ;;  %v1202_v33 = vpop.eup %1201 }
  0xc4   : > { %851 = vmatpush1.bf16.msra.mxu0 %v846_v23  ;;  %577 = vmatprep.mubr.bf16.mxu0 %v1331_v3  ;;  %v848_v34 = vpack.c.bf16 %v1200_v27, %v1202_v33  ;;  %v358_v33 = vld [vmem:[%s1651_s5 + $0x18] sm:$0xff] }
  0xc5   : > { %852 = vmatprep.subr.bf16.mxu0 %v849_v28 }
  0xc8   : > { %853 = vmatpush1.bf16.msra.mxu0 %v848_v34 }
  0xcb   : > { %1106 = vmatmul.mubr.msk.bf16.gmra.mrb[4].mxu0 %vm528_vm0, %v350_v35 }
  0xcc   : > { %882 = vmatprep.mubr.bf16.mxu0 %v1331_v3 }
  0xd3   : > { %1110 = vmatmul.mubr.msk.bf16.vlgmr.msra.gmra.mrb[8].mxu0 %vm528_vm0, %v349_v19 }
  0xd4   : > { %892 = vmatprep.mubr.bf16.mxu0 %v1331_v3 }
  0xdb   : > { %1111 = vmatmul.mubr.msk.bf16.gmra.mrb[12].mxu0 %vm528_vm0, %v350_v35  ;;  %v360_v35 = vpack.c.bf16 %v358_v33, %v357_v32 }
 0x196   : > { %v569_v38 = vpop.f32.mrb[0].mxu0 }
 0x197   : > { %v570_v29 = vadd.f32 %v569_v38, %v511_v36  ;;  %v571_v42 = vpop.f32.mrb[1].mxu0 }
 0x198   : > { %v572_v46 = vadd.f32 %v571_v42, %v511_v36  ;;  %v573_v48 = vpop.f32.mrb[2].mxu0 }
 0x199   : > { %1203 = vtanh.f32 %v570_v29  ;;  %v574_v49 = vadd.f32 %v573_v48, %v516_v43  ;;  %v575_v50 = vpop.f32.mrb[3].mxu0  ;;  %v603_v48 = vpop.permute.xlu0 %602 }
 0x19a   : > { %1205 = vtanh.f32 %v572_v46  ;;  %v576_v52 = vadd.f32 %v575_v50, %v516_v43 }
 0x19b   : > { %1207 = vtanh.f32 %v574_v49 }
 0x19c   : > { %1209 = vtanh.f32 %v576_v52  ;;  %v608_v52 = vpop.permute.xlu1 %607 }
 0x19e   : > { %v579_v53 = vpop.f32.mrb[4].mxu0 }
 0x19f   : > { %v580_v54 = vadd.f32 %v579_v53, %v521_v51  ;;  %v581_v31 = vpop.f32.mrb[5].mxu0 }
 0x1a0   : > { %v582_v39 = vadd.f32 %v581_v31, %v521_v51  ;;  %v583_v40 = vpop.f32.mrb[6].mxu0 }
 0x1a1   : > { %1211 = vtanh.f32 %v580_v54  ;;  %v584_v44 = vadd.f32 %v583_v40, %v526_v37  ;;  %v585_v55 = vpop.f32.mrb[7].mxu0  ;;  %v613_v40 = vpop.permute.xlu0 %612 }
 0x1a2   : > { %1213 = vtanh.f32 %v582_v39  ;;  %v586_v47 = vadd.f32 %v585_v55, %v526_v37  ;;  %v618_v55 = vpop.permute.xlu1 %617 }
 0x1a3   : > { %v1204_v56 = vpop.eup %1203  ;;  %1215 = vtanh.f32 %v584_v44 }
 0x1a4   : > { %v1206_v57 = vpop.eup %1205  ;;  %1217 = vtanh.f32 %v586_v47 }
 0x1a5   : > { %v1208_v58 = vpop.eup %1207 }
 0x1a6   : > { %v1210_v59 = vpop.eup %1209  ;;  %v884_v60 = vpop.f32.mrb[8].mxu0  ;;  %v596_v61 = vpack.c.bf16 %v1208_v58, %v1204_v56 }
 0x1a7   : > { %v885_v41 = vadd.f32 %v884_v60, %v511_v36  ;;  %v886_v45 = vpop.f32.mrb[9].mxu0  ;;  %v597_v0 = vpack.c.bf16 %v1210_v59, %v1206_v57 }
 0x1a8   : > { %v887_v63 = vadd.f32 %v886_v45, %v511_v36  ;;  %v888_v2 = vpop.f32.mrb[10].mxu0 }
 0x1a9   : > { %1219 = vtanh.f32 %v885_v41  ;;  %v889_v4 = vadd.f32 %v888_v2, %v516_v43  ;;  %626 = vmatprep.subr.bf16.mxu1 %v597_v0  ;;  %v890_v5 = vpop.f32.mrb[11].mxu0  ;;  %v690_v0 = vpop.permute.xlu0 %689 }
 0x1aa   : > { %1221 = vtanh.f32 %v887_v63  ;;  %v891_v6 = vadd.f32 %v890_v5, %v516_v43  ;;  %627 = vmatpush1.bf16.msra.mxu1 %v596_v61  ;;  %v695_v63 = vpop.permute.xlu1 %694 }
 0x1ab   : > { %v1212_v8 = vpop.eup %1211  ;;  %1223 = vtanh.f32 %v889_v4 }
 0x1ac   : > { %v1214_v9 = vpop.eup %1213  ;;  %1225 = vtanh.f32 %v891_v6 }
 0x1ad   : > { %v1216_v11 = vpop.eup %1215 }
 0x1ae   : > { %v1218_v62 = vpop.eup %1217  ;;  %v894_v1 = vpop.f32.mrb[12].mxu0  ;;  %v598_v12 = vpack.c.bf16 %v1216_v11, %v1212_v8 }
 0x1af   : > { %v895_v7 = vadd.f32 %v894_v1, %v521_v51  ;;  %v896_v14 = vpop.f32.mrb[13].mxu0  ;;  %v599_v15 = vpack.c.bf16 %v1218_v62, %v1214_v9 }
 0x1b0   : > { %v897_v16 = vadd.f32 %v896_v14, %v521_v51  ;;  %v898_v17 = vpop.f32.mrb[14].mxu0 }
 0x1b1   : > { %1227 = vtanh.f32 %v895_v7  ;;  %v899_v18 = vadd.f32 %v898_v17, %v526_v37  ;;  %628 = vmatprep.subr.bf16.mxu1 %v599_v15  ;;  %v900_v19 = vpop.f32.mrb[15].mxu0  ;;  %v700_v17 = vpop.permute.xlu0 %699 }
 0x1b2   : > { %1229 = vtanh.f32 %v897_v16  ;;  %v901_v21 = vadd.f32 %v900_v19, %v526_v37  ;;  %629 = vmatpush1.bf16.msra.mxu1 %v598_v12 }
 0x1b3   : > { %v1220_v22 = vpop.eup %1219  ;;  %1231 = vtanh.f32 %v899_v18 }
 0x1b4   : > { %v1222_v23 = vpop.eup %1221  ;;  %1233 = vtanh.f32 %v901_v21  ;;  %v705_v21 = vpop.permute.xlu1 %704 }
 0x1b5   : > { %v1224_v27 = vpop.eup %1223  ;;  %1107 = vmatmul.mubr.msk.bf16.vlgmr.msra.gmra.mrb[0].mxu1 %vm528_vm0, %v359_v20 }
 0x1b6   : > { %v1226_v28 = vpop.eup %1225  ;;  %v911_v30 = vpack.c.bf16 %v1224_v27, %v1220_v22  ;;  %668 = vmatprep.mubr.bf16.mxu1 %v1331_v3 }
 0x1b7   : > { %v912_v34 = vpack.c.bf16 %v1226_v28, %v1222_v23 }
 0x1b9   : > { %915 = vmatprep.subr.bf16.mxu1 %v912_v34 }
 0x1ba   : > { %916 = vmatpush1.bf16.msra.mxu1 %v911_v30 }
 0x1bb   : > { %v1228_v36 = vpop.eup %1227 }
 0x1bc   : > { %v1230_v38 = vpop.eup %1229 }
 0x1bd   : > { %v1232_v29 = vpop.eup %1231  ;;  %1108 = vmatmul.mubr.msk.bf16.gmra.mrb[4].mxu1 %vm528_vm0, %v360_v35 }
 0x1be   : > { %v1234_v42 = vpop.eup %1233  ;;  %v913_v43 = vpack.c.bf16 %v1232_v29, %v1228_v36  ;;  %947 = vmatprep.mubr.bf16.mxu1 %v1331_v3 }
 0x1bf   : > { %v914_v46 = vpack.c.bf16 %v1234_v42, %v1230_v38 }
 0x1c1   : > { %917 = vmatprep.subr.bf16.mxu1 %v914_v46 }
 0x1c2   : > { %918 = vmatpush1.bf16.msra.mxu1 %v913_v43 }
 0x1c5   : > { %1112 = vmatmul.mubr.msk.bf16.vlgmr.msra.gmra.mrb[8].mxu1 %vm528_vm0, %v359_v20 }
 0x1c6   : > { %957 = vmatprep.mubr.bf16.mxu1 %v1331_v3 }
 0x1cd   : > { %1113 = vmatmul.mubr.msk.bf16.gmra.mrb[12].mxu1 %vm528_vm0, %v360_v35 }
 0x288   : > { %v660_v49 = vpop.f32.mrb[0].mxu1 }
 0x289   : > { %v661_v50 = vadd.f32 %v660_v49, %v603_v48  ;;  %v662_v51 = vpop.f32.mrb[1].mxu1 }
 0x28a   : > { %v663_v53 = vadd.f32 %v662_v51, %v603_v48  ;;  %v664_v54 = vpop.f32.mrb[2].mxu1 }
 0x28b   : > { %1235 = vtanh.f32 %v661_v50  ;;  %v665_v31 = vadd.f32 %v664_v54, %v608_v52  ;;  %v666_v37 = vpop.f32.mrb[3].mxu1 }
 0x28c   : > { %1237 = vtanh.f32 %v663_v53  ;;  %v667_v39 = vadd.f32 %v666_v37, %v608_v52 }
 0x28d   : > { %1239 = vtanh.f32 %v665_v31 }
 0x28e   : > { %1241 = vtanh.f32 %v667_v39 }
 0x290   : > { %v670_v44 = vpop.f32.mrb[4].mxu1 }
 0x291   : > { %v671_v3 = vadd.f32 %v670_v44, %v613_v40  ;;  %v672_v47 = vpop.f32.mrb[5].mxu1 }
 0x292   : > { %v673_v56 = vadd.f32 %v672_v47, %v613_v40  ;;  %v674_v57 = vpop.f32.mrb[6].mxu1 }
 0x293   : > { %1243 = vtanh.f32 %v671_v3  ;;  %v675_v58 = vadd.f32 %v674_v57, %v618_v55  ;;  %v676_v59 = vpop.f32.mrb[7].mxu1  ;;  %v1333_v57 = vmov 1966171168  }
 0x294   : > { %1245 = vtanh.f32 %v673_v56  ;;  %v677_v60 = vadd.f32 %v676_v59, %v618_v55 }
 0x295   : > { %v1236_v61 = vpop.eup %1235  ;;  %1247 = vtanh.f32 %v675_v58  ;;  %v748_v58 = vunpack.c.l.s4 %v1333_v57 }
 0x296   : > { %v1238_v41 = vpop.eup %1237  ;;  %1249 = vtanh.f32 %v677_v60  ;;  %v707_v4 = vmul.f32 %v1236_v61, %v690_v0 }
 0x297   : > { %v1240_v45 = vpop.eup %1239  ;;  %v708_v8 = vmul.f32 %v1238_v41, %v690_v0 }
 0x298   : > { %v1242_v2 = vpop.eup %1241  ;;  %v709_v5 = vmul.f32 %v1240_v45, %v695_v63  ;;  %v949_v6 = vpop.f32.mrb[8].mxu1 }
 0x299   : > { %v710_v9 = vmul.f32 %v1242_v2, %v695_v63  ;;  %v950_v11 = vadd.f32 %v949_v6, %v603_v48  ;;  %v951_v62 = vpop.f32.mrb[9].mxu1 }
 0x29a   : > { %v715_v1 = vadd.f32 %v709_v5, %v707_v4  ;;  %v952_v12 = vadd.f32 %v951_v62, %v603_v48  ;;  %v953_v13 = vpop.f32.mrb[10].mxu1  ;;  %v749_v5 = vunpack.c.0.s8 %v748_v58 }
 0x29b   : > { %v724_v10 = vadd.f32 %v710_v9, %v708_v8  ;;  %1251 = vtanh.f32 %v950_v11  ;;  %v954_v7 = vadd.f32 %v953_v13, %v608_v52  ;;  %v955_v14 = vpop.f32.mrb[11].mxu1 }
 0x29c   : > { %1253 = vtanh.f32 %v952_v12  ;;  %v956_v15 = vadd.f32 %v955_v14, %v608_v52 }
 0x29d   : > { %v1244_v16 = vpop.eup %1243  ;;  %1255 = vtanh.f32 %v954_v7 }
 0x29e   : > { %v1246_v18 = vpop.eup %1245  ;;  %v711_v19 = vmul.f32 %v1244_v16, %v700_v17  ;;  %1257 = vtanh.f32 %v956_v15  ;;  %v752_v16 = vsub.s32 %v749_v5, %v1505_v25 }
 0x29f   : > { %v1248_v20 = vpop.eup %1247  ;;  %v712_v22 = vmul.f32 %v1246_v18, %v700_v17 }
 0x2a0   : > { %v1250_v23 = vpop.eup %1249  ;;  %v716_v27 = vadd.f32 %v715_v1, %v711_v19  ;;  %v713_v28 = vmul.f32 %v1248_v20, %v705_v21  ;;  %v959_v30 = vpop.f32.mrb[12].mxu1 }
 0x2a1   : > { %v725_v32 = vadd.f32 %v724_v10, %v712_v22  ;;  %v714_v33 = vmul.f32 %v1250_v23, %v705_v21  ;;  %v960_v34 = vadd.f32 %v959_v30, %v613_v40  ;;  %v961_v35 = vpop.f32.mrb[13].mxu1 }
 0x2a2   : > { %v717_v36 = vadd.f32 %v716_v27, %v713_v28  ;;  %v962_v38 = vadd.f32 %v961_v35, %v613_v40  ;;  %v963_v29 = vpop.f32.mrb[14].mxu1 }
 0x2a3   : > { %v726_v42 = vadd.f32 %v725_v32, %v714_v33  ;;  %1259 = vtanh.f32 %v960_v34  ;;  %v964_v43 = vadd.f32 %v963_v29, %v618_v55  ;;  %v965_v46 = vpop.f32.mrb[15].mxu1 }
 0x2a4   : > { %v718_v48 = vrot.slane %v717_v36, 4  ;;  %1261 = vtanh.f32 %v962_v38  ;;  %v966_v49 = vadd.f32 %v965_v46, %v618_v55  ;;  %v736_v55 = vpop.permute.xlu0 %735 }
 0x2a5   : > { %v1252_v50 = vpop.eup %1251  ;;  %v727_v51 = vrot.slane %v726_v42, 4  ;;  %1263 = vtanh.f32 %v964_v43  ;;  %v741_v8 = vrot.slane %v736_v55, %v1511_v26 }
 0x2a6   : > { %v1254_v52 = vpop.eup %1253  ;;  %v719_v53 = vadd.f32 %v718_v48, %v717_v36  ;;  %1265 = vtanh.f32 %v966_v49  ;;  %v976_v44 = vmul.f32 %v1252_v50, %v690_v0 }
 0x2a7   : > { %v1256_v54 = vpop.eup %1255  ;;  %v728_v31 = vadd.f32 %v727_v51, %v726_v42  ;;  %v977_v47 = vmul.f32 %v1254_v52, %v690_v0 }
 0x2a8   : > { %v1258_v37 = vpop.eup %1257  ;;  %v720_v39 = vrot.slane %v719_v53, 2  ;;  %v978_v40 = vmul.f32 %v1256_v54, %v695_v63 }
 0x2a9   : > { %v729_v3 = vrot.slane %v728_v31, 2  ;;  %v979_v56 = vmul.f32 %v1258_v37, %v695_v63 }
 0x2aa   : > { %v721_v59 = vadd.f32 %v720_v39, %v719_v53  ;;  %v984_v60 = vadd.f32 %v978_v40, %v976_v44 }
 0x2ab   : > { %v730_v61 = vadd.f32 %v729_v3, %v728_v31  ;;  %v993_v41 = vadd.f32 %v979_v56, %v977_v47 }
 0x2ac   : > { %v722_v45 = vrot.slane %v721_v59, 1 }
 0x2ad   : > { %v1260_v2 = vpop.eup %1259  ;;  %v731_v4 = vrot.slane %v730_v61, 1 }
 0x2ae   : > { %v1262_v6 = vpop.eup %1261  ;;  %v980_v9 = vmul.f32 %v1260_v2, %v700_v17  ;;  %v723_v11 = vadd.f32 %v722_v45, %v721_v59 }
 0x2af   : > { %v1264_v0 = vpop.eup %1263  ;;  %v981_v63 = vmul.f32 %v1262_v6, %v700_v17  ;;  %v732_v62 = vadd.f32 %v731_v4, %v730_v61 }
 0x2b0   : > { %v1266_v1 = vpop.eup %1265  ;;  %v985_v12 = vadd.f32 %v984_v60, %v980_v9  ;;  %v982_v13 = vmul.f32 %v1264_v0, %v705_v21  ;;  %v742_v10 = vadd.f32 %v741_v8, %v723_v11 }
 0x2b1   : > { %v994_v7 = vadd.f32 %v993_v41, %v981_v63  ;;  %v983_v14 = vmul.f32 %v1266_v1, %v705_v21  ;;  %v743_v15 = vadd.f32 %v741_v8, %v732_v62 }
 0x2b2   : > { %v986_v18 = vadd.f32 %v985_v12, %v982_v13 }
 0x2b3   : > { %v995_v19 = vadd.f32 %v994_v7, %v983_v14  ;;  %v746_v26 = vcombine.low %v742_v10, %v743_v15 }
 0x2b4   : > { %v987_v20 = vrot.slane %v986_v18, 4 }
 0x2b5   : > { %v996_v22 = vrot.slane %v995_v19, 4  ;;  %v753_v23 = vrot.slane %v746_v26, %v752_v16 }
 0x2b6   : > { %v988_v17 = vadd.f32 %v987_v20, %v986_v18 }
 0x2b7   : > { %v997_v28 = vadd.f32 %v996_v22, %v995_v19  ;;  %v760_v21 = vrot.slane %v753_v23, %v752_v16 }
 0x2b8   : > { %v989_v30 = vrot.slane %v988_v17, 2 }
 0x2b9   : > { %v998_v32 = vrot.slane %v997_v28, 2  ;;  %766 = vst.msk [vmem:[%s328_s17] sm:$0x3] %vm1590_vm1, %v760_v21 }
 0x2ba   : > { %v990_v25 = vadd.f32 %v989_v30, %v988_v17 }
 0x2bb   : > { %v999_v33 = vadd.f32 %v998_v32, %v997_v28 }
 0x2bc   : > { %v991_v34 = vrot.slane %v990_v25, 1 }
 0x2bd   : > { %v1000_v35 = vrot.slane %v999_v33, 1 }
 0x2be   : > { %v992_v36 = vadd.f32 %v991_v34, %v990_v25 }
 0x2bf   : > { %v1001_v24 = vadd.f32 %v1000_v35, %v999_v33 }
 0x2c0   : > { %v1002_v38 = vadd.f32 %v992_v36, %v741_v8 }
 0x2c1   : > { %v1003_v29 = vadd.f32 %v1001_v24, %v741_v8 }
 0x2c3   : > { %v1006_v42 = vcombine.low %v1002_v38, %v1003_v29 }
 0x2c5   : > { %v1013_v43 = vrot.slane %v1006_v42, %v752_v16 }
 0x2c7   : > { %v1020_v46 = vrot.slane %v1013_v43, %v752_v16 }
 0x2c9   : > { %1114 = vst.msk [vmem:[%s328_s17 + $0x2] sm:$0x3] %vm1590_vm1, %v1020_v46 }
 0x2ca   : > { %1280 = shalt.err (!%p1277_p3)
}
 0x2cb   : > { %s1281_s30 = scalar_lea.hbm %s1600_s25, 64  ;;  %s1285_s17 = scalar_lea.hbm %s1655_s9, 128 }
 0x2cc   : > { %p1282_p4 = scmp.ne.s32.totalorder %s1600_s25, %s1281_s30  ;;  %p1286_p9 = scmp.lt.u32.totalorder %s1600_s25, %s1655_s9 }
 0x2cd   : > { %p1287_p10 = scmp.lt.u32.totalorder %s1285_s17, %s1281_s30  ;;  %p1289_p12 = scmp.lt.u32.totalorder %s1281_s30, %s1600_s25 }
 0x2ce   : > { %p1283_p7 = pnand %p1282_p4, %p1426_p5 }
 0x2cf   : > { %p1288_p11 = por %p1287_p10, %p1286_p9 }
 0x2d0   : > { %p1284_p8 = pneg %p1283_p7 }
 0x2d1   : > { %p1290_p13 = por %p1289_p12, %p1288_p11 }
 0x2d3   : > { %p1291_p0 = pnand %p1290_p13, %p1284_p8 }
 0x2d5   : > { %1294 = shalt.err (!%p1291_p0)
}
 0x2d6   : > { %1121 = dma.vmem_to_hbm [thread:$0]  (%p1426_p5), %s1602_s22, 64, %s1600_s25, %s1025_s26  }
 0x2d7 PF: > { %p1127_p1 = scmp.ge.s32.totalorder %s1329_s14, 2  ;;  %s1051_s24 = sand.u32 1, %s1317_s11  }
 0x2d8   : > { %s1052_s27 = scalar_lea.sflag [#allocation4], %s1051_s24 }
 0x2d9   : > { %p1124_p2 = pnand %p1127_p1, %p1430_p6 }
 0x2db   : > { %1312 = dma.done.wait (!%p1124_p2), %s1052_s27, 64  }
 0x2dc   : > { %1314 = vsyncadd (!%p1124_p2), %s1052_s27, 4294967232  ;;  %p21_p3 = scmp.ge.s32.totalorder %s1413_s16, 4   ;;  %s1660_s11 = smov %s1321_s12 }
 0x2dd   : > { %s1661_s12 = smov %s1325_s13  ;;  %s1662_s13 = smov %s1424_s19 }
 0x2de   : > { %s1663_s14 = smov %s1413_s16  ;;  %23 = sbr.rel (!%p21_p3) target bundleno = 6 (0x6), region = 93 }
 0x2e5   :  { %1057 = vsyncpa [#allocation4], 1 }
 0x2e6   :  { %1059 = vsyncpa [#allocation4 + $0x1], 1 }

</bundles_post_ra>
